<compile_context>
chip_gen: v7x
topology: tpu7x:2x2x1
jax: 0.10.0
libtpu: 0.0.40
codegen_flags: <defaults>
</compile_context>

<pallas_src>
import functools

import jax
import jax.numpy as jnp
from jax import lax
from jax.experimental import pallas as pl
from jax.experimental.pallas import tpu as pltpu


# Conservative VMEM budget: fits inside v7x's 64 MiB physical VMEM and well
# inside v5e/v6e's 128 MiB; used both to clamp the batch tile and as the
# explicit scoped-VMEM limit (v5e's default is only 16 MiB).
_VMEM_BUDGET_BYTES = 48 * 1024 * 1024


def _round_up(x: int, m: int) -> int:
    return ((x + m - 1) // m) * m


def _round_down(x: int, m: int) -> int:
    return (x // m) * m


def _linear_kernel(x_ref, w_ref, b_ref, o_ref):
    """One batch tile of logits = x @ W^T + bias.

    x_ref: (bm, d)      flattened input tile
    w_ref: (C_pad, d)   full weight, PyTorch layout, resident (single-buffered)
    b_ref: (1, C_pad)   padded bias, resident (single-buffered)
    o_ref: (bm, C_pad)  lane-dense output tile
    """
    logits = lax.dot_general(
        x_ref[...],
        w_ref[...],
        dimension_numbers=(((1,), (1,)), ((), ())),  # contract both last axes
        preferred_element_type=jnp.float32,
    )
    o_ref[...] = (logits + b_ref[...]).astype(o_ref.dtype)


def prepare_params(weight, bias):
    """Pad classes to a multiple of 128 lanes ONCE, outside the jitted forward.

    weight: (num_classes, 3*h*w)  -- PyTorch nn.Linear layout (not transposed)
    bias:   (num_classes,)
    """
    num_classes, _ = weight.shape
    c_pad = _round_up(num_classes, 128)
    w_p = jnp.pad(weight, ((0, c_pad - num_classes), (0, 0)))
    b_p = jnp.pad(bias, (0, c_pad - num_classes)).reshape(1, c_pad)
    return w_p, b_p


@functools.partial(jax.jit, static_argnames=("num_classes", "bm"))
def linear_classifier_forward(x, w_p, b_p, *, num_classes, bm=1024):
    """Forward pass of LinearClassifier.

    Args:
        x:           (b, 3, h, w) image, float32
        w_p:         (C_pad, 3*h*w) class-padded weight from prepare_params
        b_p:         (1, C_pad)     class-padded bias from prepare_params
        num_classes: true number of classes (logits are sliced back to it)
        bm:          max batch (M) tile size

    Returns:
        (b, num_classes) logits
    """
    b = x.shape[0]
    d = x.shape[1] * x.shape[2] * x.shape[3]
    c_pad = w_p.shape[0]
    assert w_p.shape[1] == d and b_p.shape == (1, c_pad)

    # Flatten exactly like torch's x.view(batch_size, -1) (row-major NCHW).
    x_flat = x.reshape(b, d)

    # A tiny batch is padded up to one sublane (negligible copy). Larger
    # batches are never padded: the last grid tile may be partial and its
    # out-of-range rows are garbage that the final slice discards.
    b_rows = b
    if b_rows < 8:
        x_flat = jnp.pad(x_flat, ((0, 8 - b_rows), (0, 0)))
        b_rows = 8

    # Pick the batch tile: as large as requested, clamped by the batch and by
    # the VMEM budget (x tile + out tile double-buffered, weight/bias x1).
    fixed_bytes = c_pad * d * 4 + c_pad * 4          # weight + bias, single-buffered
    per_row_bytes = 2 * 4 * (d + c_pad)              # x + out tiles, double-buffered
    bm_budget = max(8, _round_down(max(0, _VMEM_BUDGET_BYTES - fixed_bytes) // per_row_bytes, 8))
    bm_eff = max(8, min(_round_down(max(bm, 8), 8), bm_budget, _round_up(b_rows, 8)))

    num_tiles = pl.cdiv(b_rows, bm_eff)
    out_rows = num_tiles * bm_eff  # padded output rows -> all stores are full, unmasked

    # TODO(synk): for very large d (e.g. a 224x224x3 flatten, ~73 MiB weight) the
    # fully-resident weight no longer fits v7x VMEM even single-buffered; that
    # regime needs a K(=d) reduction grid axis with an f32 VMEM accumulator.
    # Classifier-sized d (3*64*64 -> 6 MiB weight) fits comfortably everywhere.
    out = pl.pallas_call(
        _linear_kernel,
        out_shape=jax.ShapeDtypeStruct((out_rows, c_pad), x.dtype),
        grid=(num_tiles,),
        in_specs=[
            pl.BlockSpec((bm_eff, d), lambda i: (i, 0)),            # x batch tile
            pl.BlockSpec((c_pad, d), lambda i: (0, 0),
                         pipeline_mode=pl.Buffered(1)),             # weight, resident, x1
            pl.BlockSpec((1, c_pad), lambda i: (0, 0),
                         pipeline_mode=pl.Buffered(1)),             # bias, resident, x1
        ],
        out_specs=pl.BlockSpec((bm_eff, c_pad), lambda i: (i, 0)),
        compiler_params=pltpu.CompilerParams(
            # Batch tiles are independent; on multi-TC parts they can be
            # sharded across cores.
            dimension_semantics=("parallel",),
            # Explicit limit so v5e's 16 MiB default scoped VMEM never caps bm.
            vmem_limit_bytes=_VMEM_BUDGET_BYTES,
        ),
    )(x_flat, w_p, b_p)

    return out[:b, :num_classes]


def init_params(h, w, num_classes, key):
    """Deterministic init mimicking nn.Linear's default (uniform +-1/sqrt(fan_in))."""
    d = 3 * h * w
    k_w, k_b = jax.random.split(key)
    bound = 1.0 / jnp.sqrt(float(d))
    weight = jax.random.uniform(
        k_w, (num_classes, d), dtype=jnp.float32, minval=-bound, maxval=bound
    )
    bias = jax.random.uniform(
        k_b, (num_classes,), dtype=jnp.float32, minval=-bound, maxval=bound
    )
    return weight, bias


if __name__ == "__main__":
    # Small shapes consistent with the module: b=2, channels=3 (fixed), h=w=16.
    B, H, W, NUM_CLASSES = 2, 16, 16, 6

    key = jax.random.PRNGKey(0)
    k_x, k_p = jax.random.split(key)
    x = jax.random.normal(k_x, (B, 3, H, W), dtype=jnp.float32)
    weight, bias = init_params(H, W, NUM_CLASSES, k_p)

    # Class padding happens once, outside the jitted forward.
    w_p, b_p = prepare_params(weight, bias)

    logits = linear_classifier_forward(x, w_p, b_p, num_classes=NUM_CLASSES)
    logits = jax.block_until_ready(logits)

    # Reference check in plain JAX.
    ref = x.reshape(B, -1) @ weight.T + bias
    assert logits.shape == (B, NUM_CLASSES)
    assert jnp.allclose(logits, ref, atol=1e-4, rtol=1e-4)

    print("KERNEL_OK")
</pallas_src>

<mosaic_0001>
module attributes {stable_mosaic.version = 11 : i64} {
  func.func @_linear_kernel(%arg0: i32, %arg1: memref<8x768xf32, #tpu.memory_space<vmem>>, %arg2: memref<128x768xf32, #tpu.memory_space<vmem>>, %arg3: memref<1x128xf32, #tpu.memory_space<vmem>>, %arg4: memref<8x128xf32, #tpu.memory_space<vmem>>) attributes {dimension_semantics = [#tpu.dimension_semantics<parallel>], iteration_bounds = array<i64: 1>, scalar_prefetch = 0 : i64, scratch_operands = 0 : i64, tpu.core_type = #tpu.core_type<tc>, window_params = [{transform_indices = @transform_0, window_bounds = array<i64: 8, 768>}, {pipeline_mode = #tpu.pipeline_mode<synchronous>, transform_indices = @transform_1, window_bounds = array<i64: 128, 768>}, {pipeline_mode = #tpu.pipeline_mode<synchronous>, transform_indices = @transform_2, window_bounds = array<i64: 1, 128>}, {transform_indices = @transform_3, window_bounds = array<i64: 8, 128>}]} {
    %c0 = arith.constant 0 : index
    %c0_0 = arith.constant 0 : index
    %0 = vector.load %arg1[%c0, %c0_0] : memref<8x768xf32, #tpu.memory_space<vmem>>, vector<8x768xf32>
    %c0_1 = arith.constant 0 : index
    %c0_2 = arith.constant 0 : index
    %1 = vector.load %arg2[%c0_1, %c0_2] : memref<128x768xf32, #tpu.memory_space<vmem>>, vector<128x768xf32>
    %cst = arith.constant dense<0.000000e+00> : vector<8x128xf32>
    %2 = tpu.matmul %0, %1, %cst {dimension_numbers = #tpu.dot_dimension_numbers<[1], [1], [0], [0], [0, 0, 1, 0], [], []>} : vector<8x768xf32>, vector<128x768xf32>, vector<8x128xf32> -> vector<8x128xf32>
    %c0_3 = arith.constant 0 : index
    %c0_4 = arith.constant 0 : index
    %3 = vector.load %arg3[%c0_3, %c0_4] : memref<1x128xf32, #tpu.memory_space<vmem>>, vector<1x128xf32>
    %4 = vector.broadcast %3 : vector<1x128xf32> to vector<8x128xf32>
    %5 = arith.addf %2, %4 : vector<8x128xf32>
    %c0_5 = arith.constant 0 : index
    %c0_6 = arith.constant 0 : index
    %6 = vector.load %arg4[%c0_5, %c0_6] : memref<8x128xf32, #tpu.memory_space<vmem>>, vector<8x128xf32>
    tpu.vector_store %arg4[%c0_5, %c0_6], %5 {strides = array<i32>} : memref<8x128xf32, #tpu.memory_space<vmem>>, vector<8x128xf32>,
    return
  }
  func.func @transform_0(%arg0: i32) -> (i32, i32) {
    %c0_i32 = arith.constant 0 : i32
    %c0_i32_0 = arith.constant 0 : i32
    return %arg0, %c0_i32 : i32, i32
  }
  func.func @transform_1(%arg0: i32) -> (i32, i32) {
    %c0_i32 = arith.constant 0 : i32
    %c0_i32_0 = arith.constant 0 : i32
    %c0_i32_1 = arith.constant 0 : i32
    return %c0_i32, %c0_i32_0 : i32, i32
  }
  func.func @transform_2(%arg0: i32) -> (i32, i32) {
    %c0_i32 = arith.constant 0 : i32
    %c0_i32_0 = arith.constant 0 : i32
    %c0_i32_1 = arith.constant 0 : i32
    return %c0_i32, %c0_i32_0 : i32, i32
  }
  func.func @transform_3(%arg0: i32) -> (i32, i32) {
    %c0_i32 = arith.constant 0 : i32
    %c0_i32_0 = arith.constant 0 : i32
    return %arg0, %c0_i32 : i32, i32
  }
}

</mosaic_0001>

<bundles_post_ra>
// kernel: linear_classifier_forward.1
= control target key start
LH: loop header
LB: loop body
LE: loop exit
PB: predicated region body
PF: predicated region fallthrough
CT: control target
= control target key end

     0   :  { %8 = vsyncpa [#allocation3], 0  ;;  %s481_s12 = smov [#allocation2]   ;;  %s540_s0 = inlined_call_operand.vmem [shape: f32[8,768], index: 0, kind: input, shape index: {}]   ;;  %s541_s1 = inlined_call_operand.hbm [shape: f32[128,768], index: 1, kind: input, shape index: {}]   ;;  %s542_s2 = inlined_call_operand.vmem [shape: f32[1,128], index: 2, kind: input, shape index: {}]   ;;  %s543_s3 = inlined_call_operand.vmem [shape: f32[8,128], index: 3, kind: output, shape index: {}]  }
   0x1   :  { %s16_s13 = sshll.u32 %s481_s12, 4  ;;  %s457_s16 = scalar_lea.hbm %s541_s1, 12288  ;;  %s17_s13 = int_to_ptr.vmem [resolvable:$true] %s16_s13 }
   0x2   :  { %p458_p0 = scmp.ne.s32.totalorder %s541_s1, %s457_s16  ;;  %p461_p1 = scmp.lt.u32.totalorder %s457_s16, %s541_s1 }
   0x4   :  { %p463_p2 = pnand %p461_p1, %p458_p0 }
   0x6   :  { %466 = shalt.err (!%p463_p2)
}
   0x7   :  { %s467_s21 = scalar_lea.vmem %s17_s13, 12288  ;;  %p472_p4 = scmp.lt.s32.totalorder %s17_s13, %s17_s13 }
   0x8   :  { %p468_p3 = scmp.ne.s32.totalorder %s17_s13, %s467_s21  ;;  %p473_p5 = scmp.lt.s32.totalorder %s467_s21, %s467_s21 }
   0xa   :  { %p474_p6 = por %p473_p5, %p472_p4 }
   0xc   :  { %p475_p7 = pnand %p474_p6, %p468_p3 }
   0xe   :  { %478 = shalt.err (!%p475_p7)
}
   0xf   :  { %s482_s22 = smov 768   ;;  %s483_s23 = smov 48  }
  0x10   :  { %22 = dma.hbm_to_vmem [thread:$0]  %s541_s1, 12288, %s17_s13, [#allocation3], %s482_s22, %s482_s22, %s483_s23  }
  0x11   :  { %479 = dma.done.wait [#allocation3], 12288  }
  0x12   :  { %480 = vsyncadd [#allocation3], 4294955008  ;;  %v37_v0 = vld [vmem:[#allocation2 + $0x18] sm:$0xff]  ;;  %v43_v1 = vld [vmem:[#allocation2 + $0x48] sm:$0xff] }
  0x13   :  { %v36_v2 = vld [vmem:[#allocation2 + $0x10] sm:$0xff]  ;;  %v386_v3 = vpack.c.bf16 %v43_v1, %v37_v0  ;;  %v42_v4 = vld [vmem:[#allocation2 + $0x40] sm:$0xff]  ;;  %v49_v5 = vld [vmem:[#allocation2 + $0x78] sm:$0xff] }
  0x14   :  { %v55_v6 = vld [vmem:[#allocation2 + $0xa8] sm:$0xff]  ;;  %v388_v7 = vpack.c.bf16 %v42_v4, %v36_v2  ;;  %v48_v9 = vld [vmem:[#allocation2 + $0x70] sm:$0xff]  ;;  %v54_v10 = vld [vmem:[#allocation2 + $0xa0] sm:$0xff] }
  0x15   :  { %v390_v8 = vpack.c.bf16 %v55_v6, %v49_v5  ;;  %387 = vmatprep.subr.bf16.mxu0 %v386_v3  ;;  %v61_v11 = vld [vmem:[#allocation2 + $0xd8] sm:$0xff]  ;;  %v67_v12 = vld [vmem:[#allocation2 + $0x108] sm:$0xff]  ;;  %v392_v13 = vpack.c.bf16 %v54_v10, %v48_v9  ;;  %v34_v17 = vld [vmem:[#allocation2] sm:$0xff] }
  0x16   :  { %389 = vmatpush1.bf16.xpose.msra.mxu0 %v388_v7  ;;  %v394_v14 = vpack.c.bf16 %v67_v12, %v61_v11  ;;  %v35_v15 = vld [vmem:[#allocation2 + $0x8] sm:$0xff]  ;;  %v41_v16 = vld [vmem:[#allocation2 + $0x38] sm:$0xff]  ;;  %v40_v18 = vld [vmem:[#allocation2 + $0x30] sm:$0xff] }
  0x17   :  { %391 = vmatprep.subr.bf16.mxu0 %v390_v8  ;;  %v354_v19 = vpack.c.bf16 %v41_v16, %v35_v15  ;;  %v356_v20 = vpack.c.bf16 %v40_v18, %v34_v17  ;;  %v31_v21 = vld [vmem:[%s540_s0 + $0x18] sm:$0xff]  ;;  %v60_v22 = vld [vmem:[#allocation2 + $0xd0] sm:$0xff]  ;;  %v66_v23 = vld [vmem:[#allocation2 + $0x100] sm:$0xff] }
  0x18   :  { %v73_v24 = vld [vmem:[#allocation2 + $0x138] sm:$0xff]  ;;  %271 = vmatprep.mubr.f32.mxu0 %v31_v21  ;;  %v79_v25 = vld [vmem:[#allocation2 + $0x168] sm:$0xff]  ;;  %v396_v29 = vpack.c.bf16 %v66_v23, %v60_v22  ;;  %v46_v30 = vld [vmem:[#allocation2 + $0x60] sm:$0xff] }
  0x19   :  { %355 = vmatprep.subr.bf16.mxu1 %v354_v19  ;;  %v47_v26 = vld [vmem:[#allocation2 + $0x68] sm:$0xff]  ;;  %v53_v27 = vld [vmem:[#allocation2 + $0x98] sm:$0xff]  ;;  %v52_v31 = vld [vmem:[#allocation2 + $0x90] sm:$0xff]  ;;  %v398_v32 = vpack.c.bf16 %v79_v25, %v73_v24 }
  0x1a   :  { %357 = vmatpush1.bf16.xpose.msra.mxu1 %v356_v20  ;;  %v358_v28 = vpack.c.bf16 %v53_v27, %v47_v26  ;;  %v59_v33 = vld [vmem:[#allocation2 + $0xc8] sm:$0xff]  ;;  %v65_v34 = vld [vmem:[#allocation2 + $0xf8] sm:$0xff]  ;;  %v360_v35 = vpack.c.bf16 %v52_v31, %v46_v30  ;;  %v72_v37 = vld [vmem:[#allocation2 + $0x130] sm:$0xff] }
  0x1b   :  { %v362_v36 = vpack.c.bf16 %v65_v34, %v59_v33  ;;  %v78_v38 = vld [vmem:[#allocation2 + $0x160] sm:$0xff]  ;;  %v85_v39 = vld [vmem:[#allocation2 + $0x198] sm:$0xff]  ;;  %v91_v40 = vld [vmem:[#allocation2 + $0x1c8] sm:$0xff] }
  0x1c   :  { %359 = vmatprep.subr.bf16.mxu1 %v358_v28  ;;  %v400_v41 = vpack.c.bf16 %v78_v38, %v72_v37  ;;  %v58_v42 = vld [vmem:[#allocation2 + $0xc0] sm:$0xff]  ;;  %v64_v43 = vld [vmem:[#allocation2 + $0xf0] sm:$0xff]  ;;  %v402_v44 = vpack.c.bf16 %v91_v40, %v85_v39  ;;  %v71_v45 = vld [vmem:[#allocation2 + $0x128] sm:$0xff] }
  0x1d   :  { %v77_v46 = vld [vmem:[#allocation2 + $0x158] sm:$0xff]  ;;  %v364_v47 = vpack.c.bf16 %v64_v43, %v58_v42  ;;  %v84_v49 = vld [vmem:[#allocation2 + $0x190] sm:$0xff]  ;;  %v90_v50 = vld [vmem:[#allocation2 + $0x1c0] sm:$0xff] }
  0x1e   :  { %393 = vmatpush1.bf16.xpose.msra.mxu0 %v392_v13  ;;  %v366_v48 = vpack.c.bf16 %v77_v46, %v71_v45  ;;  %v97_v51 = vld [vmem:[#allocation2 + $0x1f8] sm:$0xff]  ;;  %v103_v52 = vld [vmem:[#allocation2 + $0x228] sm:$0xff]  ;;  %v404_v53 = vpack.c.bf16 %v90_v50, %v84_v49  ;;  %v70_v54 = vld [vmem:[#allocation2 + $0x120] sm:$0xff] }
  0x1f   :  { %395 = vmatprep.subr.bf16.mxu0 %v394_v14  ;;  %v76_v55 = vld [vmem:[#allocation2 + $0x150] sm:$0xff]  ;;  %v29_v56 = vld [vmem:[%s540_s0 + $0x8] sm:$0xff]  ;;  %v406_v57 = vpack.c.bf16 %v103_v52, %v97_v51  ;;  %v89_v59 = vld [vmem:[#allocation2 + $0x1b8] sm:$0xff] }
  0x20   :  { %v83_v58 = vld [vmem:[#allocation2 + $0x188] sm:$0xff]  ;;  %201 = vmatprep.mubr.f32.mxu1 %v29_v56  ;;  %v368_v60 = vpack.c.bf16 %v76_v55, %v70_v54  ;;  %v96_v62 = vld [vmem:[#allocation2 + $0x1f0] sm:$0xff]  ;;  %v102_v63 = vld [vmem:[#allocation2 + $0x220] sm:$0xff] }
  0x21   :  { %v370_v61 = vpack.c.bf16 %v89_v59, %v83_v58  ;;  %v109_v0 = vld [vmem:[#allocation2 + $0x258] sm:$0xff]  ;;  %v115_v1 = vld [vmem:[#allocation2 + $0x288] sm:$0xff]  ;;  %v408_v2 = vpack.c.bf16 %v102_v63, %v96_v62  ;;  %v82_v3 = vld [vmem:[#allocation2 + $0x180] sm:$0xff] }
  0x22   :  { %361 = vmatpush1.bf16.xpose.msra.mxu1 %v360_v35  ;;  %v88_v4 = vld [vmem:[#allocation2 + $0x1b0] sm:$0xff]  ;;  %v410_v5 = vpack.c.bf16 %v115_v1, %v109_v0  ;;  %v95_v6 = vld [vmem:[#allocation2 + $0x1e8] sm:$0xff]  ;;  %v101_v7 = vld [vmem:[#allocation2 + $0x218] sm:$0xff] }
  0x23   :  { %363 = vmatprep.subr.bf16.mxu1 %v362_v36  ;;  %v372_v8 = vpack.c.bf16 %v88_v4, %v82_v3  ;;  %v374_v9 = vpack.c.bf16 %v101_v7, %v95_v6  ;;  %v108_v10 = vld [vmem:[#allocation2 + $0x250] sm:$0xff]  ;;  %v114_v11 = vld [vmem:[#allocation2 + $0x280] sm:$0xff]  ;;  %v121_v12 = vld [vmem:[#allocation2 + $0x2b8] sm:$0xff] }
  0x24   :  { %v127_v13 = vld [vmem:[#allocation2 + $0x2e8] sm:$0xff]  ;;  %v412_v14 = vpack.c.bf16 %v114_v11, %v108_v10  ;;  %v94_v15 = vld [vmem:[#allocation2 + $0x1e0] sm:$0xff]  ;;  %v100_v16 = vld [vmem:[#allocation2 + $0x210] sm:$0xff] }
  0x25   :  { %v414_v17 = vpack.c.bf16 %v127_v13, %v121_v12  ;;  %v107_v18 = vld [vmem:[#allocation2 + $0x248] sm:$0xff]  ;;  %v113_v19 = vld [vmem:[#allocation2 + $0x278] sm:$0xff]  ;;  %v376_v20 = vpack.c.bf16 %v100_v16, %v94_v15  ;;  %v120_v22 = vld [vmem:[#allocation2 + $0x2b0] sm:$0xff] }
  0x26   :  { %397 = vmatpush1.bf16.xpose.msra.mxu0 %v396_v29  ;;  %v378_v21 = vpack.c.bf16 %v113_v19, %v107_v18  ;;  %v126_v23 = vld [vmem:[#allocation2 + $0x2e0] sm:$0xff]  ;;  %v39_v24 = vld [vmem:[#allocation2 + $0x28] sm:$0xff]  ;;  %v45_v25 = vld [vmem:[#allocation2 + $0x58] sm:$0xff] }
  0x27   :  { %399 = vmatprep.subr.bf16.mxu0 %v398_v32  ;;  %v416_v26 = vpack.c.bf16 %v126_v23, %v120_v22  ;;  %v106_v27 = vld [vmem:[#allocation2 + $0x240] sm:$0xff]  ;;  %v112_v28 = vld [vmem:[#allocation2 + $0x270] sm:$0xff]  ;;  %v418_v29 = vpack.c.bf16 %v45_v25, %v39_v24  ;;  %v119_v30 = vld [vmem:[#allocation2 + $0x2a8] sm:$0xff] }
  0x28   :  { %v125_v31 = vld [vmem:[#allocation2 + $0x2d8] sm:$0xff]  ;;  %v380_v32 = vpack.c.bf16 %v112_v28, %v106_v27  ;;  %v38_v34 = vld [vmem:[#allocation2 + $0x20] sm:$0xff]  ;;  %v44_v35 = vld [vmem:[#allocation2 + $0x50] sm:$0xff] }
  0x29   :  { %v382_v33 = vpack.c.bf16 %v125_v31, %v119_v30  ;;  %v51_v36 = vld [vmem:[#allocation2 + $0x88] sm:$0xff]  ;;  %v57_v37 = vld [vmem:[#allocation2 + $0xb8] sm:$0xff]  ;;  %v30_v38 = vld [vmem:[%s540_s0 + $0x10] sm:$0xff]  ;;  %v420_v39 = vpack.c.bf16 %v44_v35, %v38_v34 }
  0x2a   :  { %365 = vmatpush1.bf16.xpose.msra.mxu1 %v364_v47  ;;  %v118_v40 = vld [vmem:[#allocation2 + $0x2a0] sm:$0xff]  ;;  %v422_v42 = vpack.c.bf16 %v57_v37, %v51_v36  ;;  %v33_v43 = vld [vmem:[%s540_s0 + $0x28] sm:$0xff]  ;;  %v56_v46 = vld [vmem:[#allocation2 + $0xb0] sm:$0xff] }
  0x2b   :  { %367 = vmatprep.subr.bf16.mxu1 %v366_v48  ;;  %v50_v45 = vld [vmem:[#allocation2 + $0x80] sm:$0xff]  ;;  %v63_v47 = vld [vmem:[#allocation2 + $0xe8] sm:$0xff]  ;;  %v69_v48 = vld [vmem:[#allocation2 + $0x118] sm:$0xff] }
  0x2c   :  { %v424_v49 = vpack.c.bf16 %v56_v46, %v50_v45  ;;  %v426_v50 = vpack.c.bf16 %v69_v48, %v63_v47  ;;  %v28_v51 = vld [vmem:[%s540_s0] sm:$0xff]  ;;  %v75_v54 = vld [vmem:[#allocation2 + $0x148] sm:$0xff]  ;;  %v81_v55 = vld [vmem:[#allocation2 + $0x178] sm:$0xff] }
  0x2d   :  { %v62_v52 = vld [vmem:[#allocation2 + $0xe0] sm:$0xff]  ;;  %v80_v59 = vld [vmem:[#allocation2 + $0x170] sm:$0xff]  ;;  %v105_v3 = vld [vmem:[#allocation2 + $0x238] sm:$0xff] }
  0x2e   :  { %401 = vmatpush1.bf16.xpose.msra.mxu0 %v400_v41  ;;  %v124_v41 = vld [vmem:[#allocation2 + $0x2d0] sm:$0xff]  ;;  %v74_v58 = vld [vmem:[#allocation2 + $0x140] sm:$0xff]  ;;  %v129_v15 = vld [vmem:[#allocation2 + $0x2f8] sm:$0xff] }
  0x2f   :  { %403 = vmatprep.subr.bf16.mxu0 %v402_v44  ;;  %v384_v44 = vpack.c.bf16 %v124_v41, %v118_v40  ;;  %v432_v62 = vpack.c.bf16 %v80_v59, %v74_v58  ;;  %v86_v0 = vld [vmem:[#allocation2 + $0x1a0] sm:$0xff]  ;;  %v92_v1 = vld [vmem:[#allocation2 + $0x1d0] sm:$0xff] }
  0x30   :  { %v436_v4 = vpack.c.bf16 %v92_v1, %v86_v0  ;;  %v98_v6 = vld [vmem:[#allocation2 + $0x200] sm:$0xff]  ;;  %v104_v7 = vld [vmem:[#allocation2 + $0x230] sm:$0xff] }
  0x31   :  { %v440_v10 = vpack.c.bf16 %v104_v7, %v98_v6  ;;  %v110_v12 = vld [vmem:[#allocation2 + $0x260] sm:$0xff]  ;;  %v116_v13 = vld [vmem:[#allocation2 + $0x290] sm:$0xff] }
  0x32   :  { %369 = vmatpush1.bf16.xpose.msra.mxu1 %v368_v60  ;;  %v87_v60 = vld [vmem:[#allocation2 + $0x1a8] sm:$0xff]  ;;  %v444_v16 = vpack.c.bf16 %v116_v13, %v110_v12  ;;  %v122_v18 = vld [vmem:[#allocation2 + $0x2c0] sm:$0xff]  ;;  %v128_v19 = vld [vmem:[#allocation2 + $0x2f0] sm:$0xff] }
  0x33   :  { %371 = vmatprep.subr.bf16.mxu1 %v370_v61  ;;  %v93_v61 = vld [vmem:[#allocation2 + $0x1d8] sm:$0xff]  ;;  %v353_v24 = vld [vmem:[%s542_s2] ss:$0 sm:$0xff] }
  0x34   :  { %v434_v63 = vpack.c.bf16 %v93_v61, %v87_v60 }
  0x36   :  { %405 = vmatpush1.bf16.xpose.msra.mxu0 %v404_v53  ;;  %v68_v53 = vld [vmem:[#allocation2 + $0x110] sm:$0xff] }
  0x37   :  { %407 = vmatprep.subr.bf16.mxu0 %v406_v57  ;;  %v428_v56 = vpack.c.bf16 %v68_v53, %v62_v52  ;;  %v430_v57 = vpack.c.bf16 %v81_v55, %v75_v54 }
  0x3a   :  { %373 = vmatpush1.bf16.xpose.msra.mxu1 %v372_v8  ;;  %v111_v8 = vld [vmem:[#allocation2 + $0x268] sm:$0xff] }
  0x3b   :  { %375 = vmatprep.subr.bf16.mxu1 %v374_v9  ;;  %v117_v9 = vld [vmem:[#allocation2 + $0x298] sm:$0xff] }
  0x3c   :  { %v442_v11 = vpack.c.bf16 %v117_v9, %v111_v8 }
  0x3e   :  { %409 = vmatpush1.bf16.xpose.msra.mxu0 %v408_v2  ;;  %v99_v2 = vld [vmem:[#allocation2 + $0x208] sm:$0xff] }
  0x3f   :  { %411 = vmatprep.subr.bf16.mxu0 %v410_v5  ;;  %v438_v5 = vpack.c.bf16 %v105_v3, %v99_v2 }
  0x42   :  { %377 = vmatpush1.bf16.xpose.msra.mxu1 %v376_v20  ;;  %v448_v20 = vpack.c.bf16 %v128_v19, %v122_v18 }
  0x43   :  { %379 = vmatprep.subr.bf16.mxu1 %v378_v21  ;;  %v32_v21 = vld [vmem:[%s540_s0 + $0x20] sm:$0xff] }
  0x46   :  { %413 = vmatpush1.bf16.xpose.msra.mxu0 %v412_v14  ;;  %v123_v14 = vld [vmem:[#allocation2 + $0x2c8] sm:$0xff] }
  0x47   :  { %415 = vmatprep.subr.bf16.mxu0 %v414_v17  ;;  %v446_v17 = vpack.c.bf16 %v129_v15, %v123_v14 }
  0x4a   :  { %381 = vmatpush1.bf16.xpose.msra.mxu1 %v380_v32 }
  0x4b   :  { %383 = vmatprep.subr.bf16.mxu1 %v382_v33 }
  0x4e   :  { %417 = vmatpush1.bf16.xpose.msra.mxu0 %v416_v26 }
  0x4f   :  { %419 = vmatprep.subr.bf16.mxu0 %v418_v29 }
  0x52   :  { %385 = vmatpush1.bf16.xpose.msra.mxu1 %v384_v44 }
  0x55   :  { %272 = vmatmul.mubr.f32.vlgmr.msra.gmra.mrb[0].mxu0 %v30_v38 }
  0x56   :  { %421 = vmatpush1.bf16.xpose.msra.mxu0 %v420_v39  ;;  %341 = vmatprep.mubr.f32.mxu0 %v33_v43 }
  0x57   :  { %423 = vmatprep.subr.bf16.mxu0 %v422_v42 }
  0x59   :  { %202 = vmatmul.mubr.f32.vlgmr.msra.gmra.mrb[0].mxu1 %v28_v51 }
  0x5e   :  { %425 = vmatpush1.bf16.xpose.msra.mxu0 %v424_v49 }
  0x5f   :  { %427 = vmatprep.subr.bf16.mxu0 %v426_v50 }
  0x66   :  { %429 = vmatpush1.bf16.xpose.msra.mxu0 %v428_v56 }
  0x67   :  { %431 = vmatprep.subr.bf16.mxu0 %v430_v57 }
  0x6e   :  { %433 = vmatpush1.bf16.xpose.msra.mxu0 %v432_v62 }
  0x6f   :  { %435 = vmatprep.subr.bf16.mxu0 %v434_v63 }
  0x76   :  { %437 = vmatpush1.bf16.xpose.msra.mxu0 %v436_v4 }
  0x77   :  { %439 = vmatprep.subr.bf16.mxu0 %v438_v5 }
  0x7e   :  { %441 = vmatpush1.bf16.xpose.msra.mxu0 %v440_v10 }
  0x7f   :  { %443 = vmatprep.subr.bf16.mxu0 %v442_v11 }
  0x86   :  { %445 = vmatpush1.bf16.xpose.msra.mxu0 %v444_v16 }
  0x87   :  { %447 = vmatprep.subr.bf16.mxu0 %v446_v17 }
  0x8e   :  { %449 = vmatpush1.bf16.xpose.msra.mxu0 %v448_v20 }
  0x95   :  { %342 = vmatmul.mubr.f32.vlgmr.msra.gmra.mrb[0].mxu0 %v32_v21 }
 0x12c   :  { %v203_v22 = vpop.f32.mrb[0].mxu1 }
 0x12d   :  { %v205_v23 = vpop.f32.mrb[1].mxu1  ;;  %v204_v25 = vadd.f32 %v353_v24, %v203_v22 }
 0x168   :  { %v343_v26 = vpop.f32.mrb[0].mxu0 }
 0x169   :  { %v451_v27 = vadd.f32 %v343_v26, %v204_v25  ;;  %v345_v28 = vpop.f32.mrb[1].mxu0 }
 0x16b   :  { %347 = vst [vmem:[%s543_s3] sm:$0xff] %v451_v27 }
 0x16c   :  { %352 = vsyncpa [#allocation3], 1 }

</bundles_post_ra>
